<compile_context>
chip_gen: v6e
topology: v6e:2x2x1
jax: 0.10.0
libtpu: 0.0.40
codegen_flags: <defaults>
</compile_context>

<pallas_src>
import jax
import jax.numpy as jnp
from jax.experimental import pallas as pl
from jax.experimental.pallas import tpu as pltpu

IN_FEATURES = 28 * 28
OUT_FEATURES = 10


def _round_up(x, m):
    return ((x + m - 1) // m) * m


def _mlp_kernel(x_ref, w1_ref, b1_ref, w2_ref, b2_ref, o_ref):
    # x_ref: (TB, 784) bf16    w1_ref: (784, Hp) bf16   b1_ref: (1, Hp) f32
    # w2_ref: (Hp, 10) bf16    b2_ref: (1, 10) f32      o_ref: (TB, 10) f32
    x = x_ref[...]
    # First matmul on the MXU, f32 accumulation.
    h = jnp.dot(x, w1_ref[...], preferred_element_type=jnp.float32)
    # Bias + ReLU in f32 on the VPU (v5e has no bf16 VPU path).
    h = jnp.maximum(h + b1_ref[...], 0.0)
    # Second matmul: feed the MXU in bf16, accumulate in f32.
    out = jnp.dot(h.astype(w2_ref.dtype), w2_ref[...],
                  preferred_element_type=jnp.float32) + b2_ref[...]
    o_ref[...] = out.astype(o_ref.dtype)


def simple_mlp_forward(x_nchw, w1, b1, w2, b2, *,
                       block_b=1024, compute_dtype=jnp.bfloat16):
    """x_nchw: (B, 1, 28, 28) float32. Returns logits (B, 10) float32."""
    B = x_nchw.shape[0]
    H = w1.shape[1]
    x_flat = x_nchw.reshape(B, IN_FEATURES)           # nn.Flatten() equivalent

    # ---- layout padding (numerically exact no-ops) ----
    # Hidden width -> multiple of 128 lanes: extra units are relu(0 + 0) = 0 and
    # the matching rows of W2 are zero, so the logits are unchanged.
    Hp = _round_up(H, 128)
    if Hp != H:
        w1 = jnp.pad(w1, ((0, 0), (0, Hp - H)))
        b1 = jnp.pad(b1, ((0, Hp - H),))
        w2 = jnp.pad(w2, ((0, Hp - H), (0, 0)))
    # Batch tile: multiple of 8 sublanes; pad B up to a multiple of the tile and
    # slice the padded rows off the output afterwards.
    TB = min(block_b, _round_up(B, 8))
    Bp = _round_up(B, TB)
    if Bp != B:
        x_flat = jnp.pad(x_flat, ((0, Bp - B), (0, 0)))

    # ---- stream activations & weights as bf16 (kernel is HBM-bound) ----
    x_c = x_flat.astype(compute_dtype)
    w1_c = w1.astype(compute_dtype)
    w2_c = w2.astype(compute_dtype)
    b1_f = b1.reshape(1, Hp).astype(jnp.float32)
    b2_f = b2.reshape(1, OUT_FEATURES).astype(jnp.float32)

    itemsize = jnp.dtype(compute_dtype).itemsize
    cost = pl.CostEstimate(
        flops=2 * Bp * (IN_FEATURES * Hp + Hp * OUT_FEATURES),
        transcendentals=0,
        bytes_accessed=(Bp * IN_FEATURES * itemsize          # x
                        + IN_FEATURES * Hp * itemsize        # W1
                        + Hp * OUT_FEATURES * itemsize       # W2
                        + (Hp + OUT_FEATURES) * 4            # biases
                        + Bp * OUT_FEATURES * 4),            # logits
    )

    out = pl.pallas_call(
        _mlp_kernel,
        out_shape=jax.ShapeDtypeStruct((Bp, OUT_FEATURES), jnp.float32),
        grid=(Bp // TB,),
        in_specs=[
            pl.BlockSpec((TB, IN_FEATURES), lambda i: (i, 0)),    # x: streamed
            pl.BlockSpec((IN_FEATURES, Hp), lambda i: (0, 0)),    # W1: resident
            pl.BlockSpec((1, Hp), lambda i: (0, 0)),              # b1: resident
            pl.BlockSpec((Hp, OUT_FEATURES), lambda i: (0, 0)),   # W2: resident
            pl.BlockSpec((1, OUT_FEATURES), lambda i: (0, 0)),    # b2: resident
        ],
        out_specs=pl.BlockSpec((TB, OUT_FEATURES), lambda i: (i, 0)),
        compiler_params=pltpu.CompilerParams(
            dimension_semantics=("parallel",)),                   # megacore on v7x
        cost_estimate=cost,
    )(x_c, w1_c, b1_f, w2_c, b2_f)

    return out[:B]


def init_params(key, hidden_width):
    """Deterministic init mimicking nn.Linear's uniform(-1/sqrt(fan_in), 1/sqrt(fan_in))."""
    k1, k2, k3, k4 = jax.random.split(key, 4)
    fan1 = IN_FEATURES
    bound1 = 1.0 / jnp.sqrt(fan1)
    w1 = jax.random.uniform(k1, (fan1, hidden_width), jnp.float32, -bound1, bound1)
    b1 = jax.random.uniform(k2, (hidden_width,), jnp.float32, -bound1, bound1)
    fan2 = hidden_width
    bound2 = 1.0 / jnp.sqrt(fan2)
    w2 = jax.random.uniform(k3, (hidden_width, OUT_FEATURES), jnp.float32, -bound2, bound2)
    b2 = jax.random.uniform(k4, (OUT_FEATURES,), jnp.float32, -bound2, bound2)
    return w1, b1, w2, b2


if __name__ == "__main__":
    key = jax.random.PRNGKey(0)
    k_x, k_p = jax.random.split(key)

    batch = 2
    hidden_width = 32

    # MNIST-like input: NCHW (B, 1, 28, 28)
    x = jax.random.normal(k_x, (batch, 1, 28, 28), dtype=jnp.float32)
    w1, b1, w2, b2 = init_params(k_p, hidden_width)

    out = simple_mlp_forward(x, w1, b1, w2, b2)
    out = jax.block_until_ready(out)
    assert out.shape == (batch, OUT_FEATURES)

    # Reference 1: pure-JAX forward with the same bf16-in / f32-accumulate recipe.
    x_flat = x.reshape(batch, -1)
    h_ref = jnp.dot(x_flat.astype(jnp.bfloat16), w1.astype(jnp.bfloat16),
                    preferred_element_type=jnp.float32) + b1
    h_ref = jnp.maximum(h_ref, 0.0)
    ref_bf16 = jnp.dot(h_ref.astype(jnp.bfloat16), w2.astype(jnp.bfloat16),
                       preferred_element_type=jnp.float32) + b2
    assert jnp.allclose(out, ref_bf16, atol=2e-3, rtol=2e-3), \
        float(jnp.max(jnp.abs(out - ref_bf16)))

    # Reference 2: full-f32 forward (sanity check that bf16 streaming stays accurate).
    ref_f32 = jnp.maximum(x_flat @ w1 + b1, 0.0) @ w2 + b2
    assert jnp.allclose(out, ref_f32, atol=5e-2, rtol=5e-2), \
        float(jnp.max(jnp.abs(out - ref_f32)))

    print("KERNEL_OK")
</pallas_src>

<mosaic_0001>
module attributes {stable_mosaic.version = 11 : i64} {
  func.func @_mlp_kernel(%arg0: i32, %arg1: memref<8x784xbf16, #tpu.memory_space<vmem>>, %arg2: memref<784x128xbf16, #tpu.memory_space<vmem>>, %arg3: memref<1x128xf32, #tpu.memory_space<vmem>>, %arg4: memref<128x10xbf16, #tpu.memory_space<vmem>>, %arg5: memref<1x10xf32, #tpu.memory_space<vmem>>, %arg6: memref<8x10xf32, #tpu.memory_space<vmem>>) attributes {dimension_semantics = [#tpu.dimension_semantics<parallel>], iteration_bounds = array<i64: 1>, scalar_prefetch = 0 : i64, scratch_operands = 0 : i64, tpu.core_type = #tpu.core_type<tc>, window_params = [{transform_indices = @transform_0, window_bounds = array<i64: 8, 784>}, {pipeline_mode = #tpu.pipeline_mode<synchronous>, transform_indices = @transform_1, window_bounds = array<i64: 784, 128>}, {pipeline_mode = #tpu.pipeline_mode<synchronous>, transform_indices = @transform_2, window_bounds = array<i64: 1, 128>}, {pipeline_mode = #tpu.pipeline_mode<synchronous>, transform_indices = @transform_3, window_bounds = array<i64: 128, 10>}, {pipeline_mode = #tpu.pipeline_mode<synchronous>, transform_indices = @transform_4, window_bounds = array<i64: 1, 10>}, {transform_indices = @transform_5, window_bounds = array<i64: 8, 10>}]} {
    %c0 = arith.constant 0 : index
    %c0_0 = arith.constant 0 : index
    %0 = vector.load %arg1[%c0, %c0_0] : memref<8x784xbf16, #tpu.memory_space<vmem>>, vector<8x784xbf16>
    %c0_1 = arith.constant 0 : index
    %c0_2 = arith.constant 0 : index
    %1 = vector.load %arg2[%c0_1, %c0_2] : memref<784x128xbf16, #tpu.memory_space<vmem>>, vector<784x128xbf16>
    %cst = arith.constant dense<0.000000e+00> : vector<8x128xf32>
    %2 = tpu.matmul %0, %1, %cst {dimension_numbers = #tpu.dot_dimension_numbers<[1], [0], [0], [1], [0, 0, 1, 1], [], []>} : vector<8x784xbf16>, vector<784x128xbf16>, vector<8x128xf32> -> vector<8x128xf32>
    %c0_3 = arith.constant 0 : index
    %c0_4 = arith.constant 0 : index
    %3 = vector.load %arg3[%c0_3, %c0_4] : memref<1x128xf32, #tpu.memory_space<vmem>>, vector<1x128xf32>
    %4 = vector.broadcast %3 : vector<1x128xf32> to vector<8x128xf32>
    %5 = arith.addf %2, %4 : vector<8x128xf32>
    %cst_5 = arith.constant 0.000000e+00 : f32
    %6 = vector.broadcast %cst_5 : f32 to vector<8x128xf32>
    %7 = arith.maximumf %5, %6 : vector<8x128xf32>
    %8 = arith.truncf %7 : vector<8x128xf32> to vector<8x128xbf16>
    %c0_6 = arith.constant 0 : index
    %c0_7 = arith.constant 0 : index
    %9 = vector.load %arg4[%c0_6, %c0_7] : memref<128x10xbf16, #tpu.memory_space<vmem>>, vector<128x10xbf16>
    %cst_8 = arith.constant dense<0.000000e+00> : vector<8x10xf32>
    %10 = tpu.matmul %8, %9, %cst_8 {dimension_numbers = #tpu.dot_dimension_numbers<[1], [0], [0], [1], [0, 0, 1, 1], [], []>} : vector<8x128xbf16>, vector<128x10xbf16>, vector<8x10xf32> -> vector<8x10xf32>
    %c0_9 = arith.constant 0 : index
    %c0_10 = arith.constant 0 : index
    %11 = vector.load %arg5[%c0_9, %c0_10] : memref<1x10xf32, #tpu.memory_space<vmem>>, vector<1x10xf32>
    %12 = vector.broadcast %11 : vector<1x10xf32> to vector<8x10xf32>
    %13 = arith.addf %10, %12 : vector<8x10xf32>
    %c0_11 = arith.constant 0 : index
    %c0_12 = arith.constant 0 : index
    %14 = vector.load %arg6[%c0_11, %c0_12] : memref<8x10xf32, #tpu.memory_space<vmem>>, vector<8x10xf32>
    tpu.vector_store %arg6[%c0_11, %c0_12], %13 {strides = array<i32>} : memref<8x10xf32, #tpu.memory_space<vmem>>, vector<8x10xf32>,
    return
  }
  func.func @transform_0(%arg0: i32) -> (i32, i32) {
    %c0_i32 = arith.constant 0 : i32
    %c0_i32_0 = arith.constant 0 : i32
    return %arg0, %c0_i32 : i32, i32
  }
  func.func @transform_1(%arg0: i32) -> (i32, i32) {
    %c0_i32 = arith.constant 0 : i32
    %c0_i32_0 = arith.constant 0 : i32
    %c0_i32_1 = arith.constant 0 : i32
    return %c0_i32, %c0_i32_0 : i32, i32
  }
  func.func @transform_2(%arg0: i32) -> (i32, i32) {
    %c0_i32 = arith.constant 0 : i32
    %c0_i32_0 = arith.constant 0 : i32
    %c0_i32_1 = arith.constant 0 : i32
    return %c0_i32, %c0_i32_0 : i32, i32
  }
  func.func @transform_3(%arg0: i32) -> (i32, i32) {
    %c0_i32 = arith.constant 0 : i32
    %c0_i32_0 = arith.constant 0 : i32
    %c0_i32_1 = arith.constant 0 : i32
    return %c0_i32, %c0_i32_0 : i32, i32
  }
  func.func @transform_4(%arg0: i32) -> (i32, i32) {
    %c0_i32 = arith.constant 0 : i32
    %c0_i32_0 = arith.constant 0 : i32
    %c0_i32_1 = arith.constant 0 : i32
    return %c0_i32, %c0_i32_0 : i32, i32
  }
  func.func @transform_5(%arg0: i32) -> (i32, i32) {
    %c0_i32 = arith.constant 0 : i32
    %c0_i32_0 = arith.constant 0 : i32
    return %arg0, %c0_i32 : i32, i32
  }
}

</mosaic_0001>

<bundles_post_ra>
// kernel: tpu_custom_call.1
= control target key start
LH: loop header
LB: loop body
LE: loop exit
PB: predicated region body
PF: predicated region fallthrough
CT: control target
= control target key end

     0   :  { %10 = vsyncpa [#allocation3], 0  ;;  %s1127_s0 = inlined_call_operand.vmem [shape: bf16[8,784], index: 0, kind: input, shape index: {}]   ;;  %s1128_s1 = inlined_call_operand.hbm [shape: bf16[784,128], index: 1, kind: input, shape index: {}]   ;;  %s1129_s2 = inlined_call_operand.vmem [shape: f32[1,128], index: 2, kind: input, shape index: {}]   ;;  %s1130_s3 = inlined_call_operand.vmem [shape: bf16[128,10], index: 3, kind: input, shape index: {}]   ;;  %s1131_s4 = inlined_call_operand.vmem [shape: f32[1,10], index: 4, kind: input, shape index: {}]   ;;  %s1132_s5 = inlined_call_operand.hbm [shape: f32[8,10], index: 5, kind: output, shape index: {}]  }
   0x1   :  { %11 = vsyncpa [#allocation4], 0  ;;  %s1041_s18 = smov [#allocation2]  }
   0x2   :  { %s19_s19 = sshll.u32 %s1041_s18, 4  ;;  %s20_s19 = int_to_ptr.vmem [resolvable:$true] %s19_s19 }
   0x3   :  { %s1005_s20 = scalar_lea.vmem %s20_s19, 6272  ;;  %p1010_p1 = scmp.lt.s32.totalorder %s20_s19, %s20_s19 }
   0x4   :  { %p1006_p0 = scmp.ne.s32.totalorder %s20_s19, %s1005_s20  ;;  %p1011_p2 = scmp.lt.s32.totalorder %s1005_s20, %s1005_s20 }
   0x6   :  { %p1012_p3 = por %p1011_p2, %p1010_p1 }
   0x8   :  { %p1013_p4 = pnand %p1012_p3, %p1006_p0 }
   0xa   :  { %1016 = shalt.err (!%p1013_p4)
}
   0xb   :  { %s1042_s21 = smov 64   ;;  %s1043_s22 = smov 4  }
   0xc   :  { %25 = dma.hbm_to_vmem [thread:$0]  %s1128_s1, 6272, %s20_s19, [#allocation3], %s1042_s21, %s1042_s21, %s1043_s22  }
   0xd   :  { %1037 = dma.done.wait [#allocation3], 6272  }
   0xe   :  { %1038 = vsyncadd [#allocation3], 4294961024  ;;  %v933_v0 = vld [vmem:[#allocation2 + $0x78] sm:$0xff]   ;;  %v937_v4 = vld [vmem:[#allocation2 + $0x70] sm:$0xff]   ;;  %v1044_v43 = vmov 0.0   ;;  %vm1045_vm0 = vmmov 0  }
   0xf   :  { %v934_v1 = vld [vmem:[#allocation2 + $0x38] sm:$0xff]   ;;  %824 = vmatprep.subr.bf16.mxu0 %v933_v0  ;;  %v938_v5 = vld [vmem:[#allocation2 + $0x30] sm:$0xff]   ;;  %v941_v8 = vld [vmem:[#allocation2 + $0x68] sm:$0xff]   ;;  %vm463_vm1 = vcmask 130048   ;;  %s1046_s1 = smov [#allocation5]   ;;  %vm740_vm2 = vcmask 80896  }
  0x10   :  { %v935_v2 = vld [vmem:[#allocation2 + $0xf8] sm:$0xff]   ;;  %825 = vmatpush3.bf16.msra.mxu0 %v934_v1  ;;  %v939_v6 = vld [vmem:[#allocation2 + $0xf0] sm:$0xff]   ;;  %v942_v9 = vld [vmem:[#allocation2 + $0x28] sm:$0xff]   ;;  %s748_s25 = sshll.u32 %s1046_s1, 4  ;;  %s749_s25 = int_to_ptr.vmem [resolvable:$true] %s748_s25 }
  0x11   :  { %v936_v3 = vld [vmem:[#allocation2 + $0xb8] sm:$0xff]   ;;  %846 = vmatprep.subr.bf16.mxu1 %v935_v2  ;;  %826 = vmatprep.subr.bf16.mxu0 %v937_v4  ;;  %v940_v7 = vld [vmem:[#allocation2 + $0xb0] sm:$0xff]   ;;  %v943_v10 = vld [vmem:[#allocation2 + $0xe8] sm:$0xff]   ;;  %p1022_p6 = scmp.lt.s32.totalorder %s749_s25, %s749_s25 }
  0x12   :  { %847 = vmatpush3.bf16.msra.mxu1 %v936_v3  ;;  %v944_v11 = vld [vmem:[#allocation2 + $0xa8] sm:$0xff]   ;;  %v945_v12 = vld [vmem:[#allocation2 + $0x60] sm:$0xff]   ;;  %v949_v16 = vld [vmem:[#allocation2 + $0x58] sm:$0xff]  }
  0x13   :  { %848 = vmatprep.subr.bf16.mxu1 %v939_v6  ;;  %v946_v13 = vld [vmem:[#allocation2 + $0x20] sm:$0xff]   ;;  %v950_v17 = vld [vmem:[#allocation2 + $0x18] sm:$0xff]   ;;  %v953_v20 = vld [vmem:[#allocation2 + $0x50] sm:$0xff]  }
  0x14   :  { %827 = vmatpush3.bf16.msra.mxu0 %v938_v5  ;;  %v947_v14 = vld [vmem:[#allocation2 + $0xe0] sm:$0xff]   ;;  %v951_v18 = vld [vmem:[#allocation2 + $0xd8] sm:$0xff]   ;;  %v954_v21 = vld [vmem:[#allocation2 + $0x10] sm:$0xff]  }
  0x15   :  { %828 = vmatprep.subr.bf16.mxu0 %v941_v8  ;;  %v948_v15 = vld [vmem:[#allocation2 + $0xa0] sm:$0xff]   ;;  %v952_v19 = vld [vmem:[#allocation2 + $0x98] sm:$0xff]   ;;  %v955_v22 = vld [vmem:[#allocation2 + $0xd0] sm:$0xff]  }
  0x16   :  { %849 = vmatpush3.bf16.msra.mxu1 %v940_v7  ;;  %v956_v23 = vld [vmem:[#allocation2 + $0x90] sm:$0xff]   ;;  %v957_v24 = vld [vmem:[#allocation2 + $0x48] sm:$0xff]   ;;  %v961_v28 = vld [vmem:[#allocation2 + $0x40] sm:$0xff]  }
  0x17   :  { %850 = vmatprep.subr.bf16.mxu1 %v943_v10  ;;  %v958_v25 = vld [vmem:[#allocation2 + $0x8] sm:$0xff]   ;;  %v962_v29 = vld [vmem:[#allocation2] sm:$0xff]   ;;  %v967_v35 = vld [vmem:[#allocation2 + $0x178] sm:$0xff]  }
  0x18   :  { %829 = vmatpush3.bf16.msra.mxu0 %v942_v9  ;;  %v959_v26 = vld [vmem:[#allocation2 + $0xc8] sm:$0xff]   ;;  %v963_v30 = vld [vmem:[#allocation2 + $0xc0] sm:$0xff]   ;;  %v970_v39 = vld [vmem:[#allocation2 + $0x138] sm:$0xff]  }
  0x19   :  { %830 = vmatprep.subr.bf16.mxu0 %v945_v12  ;;  %v960_v27 = vld [vmem:[#allocation2 + $0x88] sm:$0xff]   ;;  %v36_v31 = vld [vmem:[%s1127_s0] sm:$0xff]  ;;  %v971_v40 = vld [vmem:[#allocation2 + $0x170] sm:$0xff]  }
  0x1a   :  { %851 = vmatpush3.bf16.msra.mxu1 %v944_v11  ;;  %v758_v32 = vcombine.low %v36_v31, %v36_v31  ;;  %v759_v33 = vcombine.high %v36_v31, %v36_v31  ;;  %v966_v34 = vld [vmem:[#allocation2 + $0x80] sm:$0xff]   ;;  %v37_v36 = vld [vmem:[%s1127_s0 + $0x8] sm:$0xff]  ;;  %v972_v41 = vld [vmem:[#allocation2 + $0x130] sm:$0xff]  }
  0x1b   :  { %852 = vmatprep.subr.bf16.mxu1 %v947_v14  ;;  %v760_v37 = vcombine.low %v37_v36, %v37_v36  ;;  %v761_v38 = vcombine.high %v37_v36, %v37_v36  ;;  %v973_v42 = vld [vmem:[#allocation2 + $0x168] sm:$0xff]   ;;  %v975_v45 = vld [vmem:[#allocation2 + $0x160] sm:$0xff]   ;;  %v977_v47 = vld [vmem:[#allocation2 + $0x158] sm:$0xff]  }
  0x1c   :  { %831 = vmatpush3.bf16.msra.mxu0 %v946_v13  ;;  %499 = vmatprep.mubr.bf16.mxu0 %v759_v33  ;;  %v974_v44 = vld [vmem:[#allocation2 + $0x128] sm:$0xff]   ;;  %v976_v46 = vld [vmem:[#allocation2 + $0x120] sm:$0xff]   ;;  %v978_v48 = vld [vmem:[#allocation2 + $0x118] sm:$0xff]  }
  0x1d   :  { %832 = vmatprep.subr.bf16.mxu0 %v949_v16  ;;  %539 = vmatprep.mubr.bf16.mxu1 %v761_v38  ;;  %v979_v49 = vld [vmem:[#allocation2 + $0x150] sm:$0xff]   ;;  %v985_v50 = vld [vmem:[#allocation2 + $0x180] sm:$0xff]   ;;  %v988_v54 = vld [vmem:[%s1127_s0 + $0x18] ss:$0 sps:$4 sm:$0xff]  }
  0x1e   :  { %853 = vmatpush3.bf16.msra.mxu1 %v948_v15  ;;  %v38_v51 = vld [vmem:[%s1127_s0 + $0x10] sm:$0xff]  ;;  %v981_v55 = vld [vmem:[#allocation2 + $0x148] sm:$0xff]   ;;  %v983_v57 = vld [vmem:[#allocation2 + $0x140] sm:$0xff]  }
  0x1f   :  { %854 = vmatprep.subr.bf16.mxu1 %v951_v18  ;;  %v980_v52 = vld [vmem:[#allocation2 + $0x110] sm:$0xff]   ;;  %v763_v53 = vcombine.high %v38_v51, %v38_v51  ;;  %v982_v56 = vld [vmem:[#allocation2 + $0x108] sm:$0xff]   ;;  %v984_v58 = vld [vmem:[#allocation2 + $0x100] sm:$0xff]   ;;  %v762_v59 = vcombine.low %v38_v51, %v38_v51 }
  0x20   :  { %833 = vmatpush3.bf16.msra.mxu0 %v950_v17  ;;  %v989_v60 = vld [vmem:[%s1130_s3 + $0x38] sm:$0xff]   ;;  %v990_v61 = vld [vmem:[%s1130_s3 + $0x30] sm:$0xff]   ;;  %v991_v62 = vld [vmem:[%s1130_s3 + $0x28] sm:$0xff]  }
  0x21   :  { %834 = vmatprep.subr.bf16.mxu0 %v953_v20  ;;  %v992_v63 = vld [vmem:[%s1130_s3 + $0x20] sm:$0xff]   ;;  %v993_v0 = vld [vmem:[%s1130_s3 + $0x18] sm:$0xff]   ;;  %v994_v1 = vld [vmem:[%s1130_s3 + $0x10] sm:$0xff]  }
  0x22   :  { %855 = vmatpush3.bf16.msra.mxu1 %v952_v19  ;;  %v995_v2 = vld [vmem:[%s1130_s3 + $0x8] sm:$0xff]   ;;  %v996_v3 = vld [vmem:[%s1130_s3] sm:$0xff]  }
  0x23   :  { %856 = vmatprep.subr.bf16.mxu1 %v955_v22  ;;  %v757_v17 = vld [vmem:[%s1129_s2] ss:$0 sm:$0xff]  ;;  %s1017_s2 = scalar_lea.vmem %s749_s25, 128 }
  0x24   :  { %835 = vmatpush3.bf16.msra.mxu0 %v954_v21  ;;  %p1018_p5 = scmp.ne.s32.totalorder %s749_s25, %s1017_s2  ;;  %p1023_p7 = scmp.lt.s32.totalorder %s1017_s2, %s1017_s2 }
  0x25   :  { %836 = vmatprep.subr.bf16.mxu0 %v957_v24 }
  0x26   :  { %857 = vmatpush3.bf16.msra.mxu1 %v956_v23  ;;  %p1024_p8 = por %p1023_p7, %p1022_p6 }
  0x27   :  { %858 = vmatprep.subr.bf16.mxu1 %v959_v26 }
  0x28   :  { %837 = vmatpush3.bf16.msra.mxu0 %v958_v25  ;;  %p1025_p9 = pnand %p1024_p8, %p1018_p5 }
  0x29   :  { %838 = vmatprep.subr.bf16.mxu0 %v961_v28 }
  0x2a   :  { %859 = vmatpush3.bf16.msra.mxu1 %v960_v27 }
  0x2b   :  { %860 = vmatprep.subr.bf16.mxu1 %v963_v30  ;;  %v815_v30 = vld [vmem:[%s1131_s4] ss:$0 sm:$0xff] }
  0x2c   :  { %839 = vmatpush3.bf16.msra.mxu0 %v962_v29 }
  0x2d   :  { %868 = vmatprep.subr.bf16.mxu0 %v967_v35 }
  0x2e   :  { %861 = vmatpush3.bf16.msra.mxu1 %v966_v34 }
  0x2f   :  { %500 = vmatmul.mubr.bf16.vlgmr.msra.gmra.mxu0 %v758_v32  ;;  %901 = vmatprep.subr.bf16.mxu1 %v1044_v43 }
  0x30   :  { %869 = vmatpush3.bf16.msra.mxu0 %v970_v39  ;;  %579 = vmatprep.mubr.bf16.mxu0 %v763_v53 }
  0x31   :  { %540 = vmatmul.mubr.bf16.vlgmr.msra.gmra.mxu1 %v760_v37  ;;  %870 = vmatprep.subr.bf16.mxu0 %v971_v40 }
  0x32   :  { %903 = vmatprep.mubr.msk.bf16.mxu1 %vm1045_vm0, %v1044_v43  ;;  %902 = vmatpush3.bf16.msra.mxu1 %v985_v50 }
  0x33   :  { %907 = vmatprep.subr.bf16.mxu1 %v1044_v43 }
  0x34   :  { %871 = vmatpush3.bf16.msra.mxu0 %v972_v41 }
  0x35   :  { %872 = vmatprep.subr.bf16.mxu0 %v973_v42 }
  0x38   :  { %873 = vmatpush3.bf16.msra.mxu0 %v974_v44 }
  0x39   :  { %874 = vmatprep.subr.bf16.mxu0 %v975_v45  ;;  %904 = vmatmul.mubr.msk.bf16.vlgmr.msra.gmra.mxu1 %vm463_vm1, %v988_v54 }
  0x3a   :  { %923 = vmatprep.mubr.msk.bf16.mxu1 %vm1045_vm0, %v1044_v43  ;;  %908 = vmatpush3.bf16.msra.mxu1 %v989_v60 }
  0x3b   :  { %909 = vmatprep.subr.bf16.mxu1 %v1044_v43 }
  0x3c   :  { %875 = vmatpush3.bf16.msra.mxu0 %v976_v46 }
  0x3d   :  { %876 = vmatprep.subr.bf16.mxu0 %v977_v47 }
  0x3e   :  { %910 = vmatpush3.bf16.msra.mxu1 %v990_v61 }
  0x3f   :  { %911 = vmatprep.subr.bf16.mxu1 %v1044_v43 }
  0x40   :  { %877 = vmatpush3.bf16.msra.mxu0 %v978_v48 }
  0x41   :  { %878 = vmatprep.subr.bf16.mxu0 %v979_v49 }
  0x42   :  { %912 = vmatpush3.bf16.msra.mxu1 %v991_v62 }
  0x43   :  { %913 = vmatprep.subr.bf16.mxu1 %v1044_v43 }
  0x44   :  { %879 = vmatpush3.bf16.msra.mxu0 %v980_v52 }
  0x45   :  { %880 = vmatprep.subr.bf16.mxu0 %v981_v55 }
  0x46   :  { %914 = vmatpush3.bf16.msra.mxu1 %v992_v63 }
  0x47   :  { %915 = vmatprep.subr.bf16.mxu1 %v1044_v43 }
  0x48   :  { %881 = vmatpush3.bf16.msra.mxu0 %v982_v56 }
  0x49   :  { %882 = vmatprep.subr.bf16.mxu0 %v983_v57 }
  0x4a   :  { %916 = vmatpush3.bf16.msra.mxu1 %v993_v0 }
  0x4b   :  { %917 = vmatprep.subr.bf16.mxu1 %v1044_v43 }
  0x4c   :  { %883 = vmatpush3.bf16.msra.mxu0 %v984_v58 }
  0x4e   :  { %918 = vmatpush3.bf16.msra.mxu1 %v994_v1 }
  0x4f   :  { %580 = vmatmul.mubr.bf16.vlgmr.msra.gmra.mxu0 %v762_v59  ;;  %919 = vmatprep.subr.bf16.mxu1 %v1044_v43 }
  0x52   :  { %920 = vmatpush3.bf16.msra.mxu1 %v995_v2 }
  0x53   :  { %921 = vmatprep.subr.bf16.mxu1 %v1044_v43 }
  0x56   :  { %922 = vmatpush3.bf16.msra.mxu1 %v996_v3 }
  0xef   :  { %v840_v4 = vpop.f32.mrf.mxu0 }
  0xf1   :  { %v841_v5 = vpop.f32.mrf.mxu0  ;;  %v862_v6 = vpop.f32.mrf.mxu1 }
  0xf2   :  { %v842_v16 = vadd.f32 %v841_v5, %v840_v4 }
  0xf3   :  { %v843_v7 = vpop.f32.mrf.mxu0  ;;  %v863_v8 = vpop.f32.mrf.mxu1 }
  0xf4   :  { %v502_v18 = vadd.f32 %v842_v16, %v757_v17  ;;  %v864_v19 = vadd.f32 %v863_v8, %v862_v6 }
  0xf5   :  { %v844_v9 = vpop.f32.mrf.mxu0  ;;  %v865_v10 = vpop.f32.mrf.mxu1 }
  0xf6   :  { %v542_v22 = vadd.f32 %v864_v19, %v502_v18 }
  0xf7   :  { %v866_v11 = vpop.f32.mrf.mxu1 }
  0xf9   :  { %v621_v12 = vpop.f32.mrf.mxu1 }
  0xfb   :  { %v905_v13 = vpop.f32.mrf.mxu1 }
  0xfd   :  { %v624_v14 = vpop.f32.mrf.mxu1 }
  0xff   :  { %v906_v15 = vpop.f32.mrf.mxu1 }
 0x10f   :  { %v884_v20 = vpop.f32.mrf.mxu0 }
 0x111   :  { %v885_v21 = vpop.f32.mrf.mxu0 }
 0x112   :  { %v886_v23 = vadd.f32 %v885_v21, %v884_v20 }
 0x113   :  { %v887_v24 = vpop.f32.mrf.mxu0 }
 0x114   :  { %v582_v25 = vadd.f32 %v886_v23, %v542_v22 }
 0x115   :  { %v888_v26 = vpop.f32.mrf.mxu0 }
 0x116   :  { %v622_v27 = vadd.f32 %v621_v12, %v582_v25 }
 0x118   :  { %v627_v28 = vmax.f32 %v622_v27, 0.0 }
 0x11a   :  { %v628_v29 = vpack.c.bf16 %v627_v28, %v627_v28 }
 0x11c   :  { %924 = vmatmul.mubr.bf16.vlgmr.msra.gmra.mxu1 %v628_v29 }
 0x1dc   :  { %v734_v31 = vpop.f32.mrf.mxu1 }
 0x1dd   :  { %v735_v32 = vadd.f32 %v815_v30, %v734_v31 }
 0x1de   :  { %v925_v33 = vpop.f32.mrf.mxu1 }
 0x1df   :  { %741 = vst.msk [vmem:[#allocation5] sm:$0xff] %vm740_vm2, %v735_v32 }
 0x1e0   :  { %v737_v34 = vpop.f32.mrf.mxu1 }
 0x1e1   :  { %1028 = shalt.err (!%p1025_p9)
}
 0x1e2   :  { %751 = dma.vmem_to_hbm [thread:$0]  %s749_s25, 128, %s1132_s5, [#allocation4]   ;;  %v926_v35 = vpop.f32.mrf.mxu1 }
 0x1e3   :  { %1039 = dma.done.wait [#allocation4], 128  }
 0x1e4   :  { %1040 = vsyncadd [#allocation4], 4294967168 }
 0x1e5   :  { %755 = vsyncpa [#allocation3], 1 }
 0x1e6   :  { %756 = vsyncpa [#allocation4], 1 }

</bundles_post_ra>
